<compile_context>
chip_gen: v5e
topology: v5e:2x2
jax: 0.10.0
libtpu: 0.0.40
codegen_flags: <defaults>
</compile_context>

<pallas_src>
import functools

import jax
import jax.numpy as jnp
from jax import lax
from jax.experimental import pallas as pl
from jax.experimental.pallas import tpu as pltpu

_LANES = 128      # TPU lane width
_SUBLANES = 8     # f32 sublanes per vreg


def _make_kernel(t_rows, steps, n_rows, coord, needs_tail):
    lane_width = _LANES * coord

    def kernel(pred_ref, gt_ref, mask_ref, loss_ref, msum_ref, e_ref):
        k = pl.program_id(1)

        @pl.when(k == 0)
        def _init():
            loss_ref[...] = jnp.zeros_like(loss_ref)
            msum_ref[...] = jnp.zeros_like(msum_ref)
            # Reduction matrix E[j, p] = 1 iff lane j belongs to point p,
            # i.e. coord*p <= j < coord*(p+1) (no integer division).
            j = lax.broadcasted_iota(jnp.int32, (lane_width, _LANES), 0)
            p = lax.broadcasted_iota(jnp.int32, (lane_width, _LANES), 1)
            start = p * coord
            e_ref[...] = ((j >= start) & (j < start + coord)).astype(jnp.float32)

        pv = pred_ref[...].astype(jnp.float32)
        gv = gt_ref[...].astype(jnp.float32)
        m = mask_ref[...].astype(jnp.float32)                      # (T, 128)

        absdiff = jnp.abs(pv - gv)                                 # (T, 128*C)
        # MXU contraction over the C coordinate lanes of each point:
        # (T, 128*C) @ (128*C, 128) -> (T, 128). E is 0/1 (exact), contraction is exact.
        point_l1 = jnp.dot(absdiff, e_ref[...],
                           preferred_element_type=jnp.float32)    # (T, 128)
        contrib = m * point_l1                                     # (T, 128)

        def _accumulate(c, mm):
            # Fold the T block rows into 8 sublanes (pure VPU adds), then add into the
            # vreg-sized per-split output accumulators (resident across the k axis).
            loss_ref[0] += jnp.sum(c.reshape(-1, _SUBLANES, _LANES), axis=0)
            msum_ref[0] += jnp.sum(mm.reshape(-1, _SUBLANES, _LANES), axis=0)

        if needs_tail:
            s = pl.program_id(0)
            base = (s * steps + k) * t_rows
            is_full = base + t_rows <= n_rows

            @pl.when(is_full)
            def _full():
                _accumulate(contrib, m)

            @pl.when(jnp.logical_not(is_full))
            def _tail():
                rows = base + lax.broadcasted_iota(jnp.int32, (t_rows, _LANES), 0)
                valid = rows < n_rows
                # Mask contrib (not just m) so OOB garbage/NaN can never reach the sums.
                _accumulate(jnp.where(valid, contrib, 0.0),
                            jnp.where(valid, m, 0.0))
        else:
            _accumulate(contrib, m)

    return kernel


def _packing(dtype):
    return max(1, 4 // jnp.dtype(dtype).itemsize)


def _target_tile_bytes():
    # Larger tiles amortize the ~0.35us/step overhead. v7x (64 MiB VMEM, 3.2 TB/s HBM)
    # wants bigger tiles; v5e/v6e (128 MiB VMEM) are fine around 3 MiB per input tile.
    try:
        vmem = getattr(pltpu.get_tpu_info(), "vmem_capacity_bytes", 128 << 20)
    except Exception:
        vmem = 128 << 20
    return (5 << 20) if vmem <= (96 << 20) else (3 << 20)


@functools.partial(jax.jit, static_argnames=("block_rows", "num_splits"))
def plane_criterion_coordinate(pred_point, gt_point, mask, *, block_rows=4096, num_splits=2):
    """pred_point/gt_point: [..., C]; mask: [..., 1] (one value per point). Scalar f32."""
    coord = pred_point.shape[-1]
    pred2 = pred_point.reshape(-1, coord)
    gt2 = gt_point.reshape(-1, coord)
    mask1 = mask.reshape(-1)
    if mask1.dtype == jnp.bool_:
        mask1 = mask1.astype(jnp.float32)
    n = pred2.shape[0]

    # Sublane multiple for the narrowest participating dtype (8 f32 / 16 bf16 / 32 int8).
    row_mult = _SUBLANES * max(_packing(pred2.dtype), _packing(gt2.dtype), _packing(mask1.dtype))

    pad = (-n) % (row_mult * _LANES)
    if pad:
        # Rare path: pad so points pack into whole sublane-aligned 128-lane rows.
        # Padded points carry mask == 0 and contribute to neither sum.
        pred2 = jnp.pad(pred2, ((0, pad), (0, 0)))
        gt2 = jnp.pad(gt2, ((0, pad), (0, 0)))
        mask1 = jnp.pad(mask1, ((0, pad),))
    n_rows = (n + pad) // _LANES
    lane_width = _LANES * coord

    # Lane-dense views: free reshapes of contiguous row-major data (no data movement).
    pred_v = pred2.reshape(n_rows, lane_width)
    gt_v = gt2.reshape(n_rows, lane_width)
    mask_v = mask1.reshape(n_rows, _LANES)

    # ---- tile / grid selection --------------------------------------------------------
    bytes_per_row = lane_width * max(pred_v.dtype.itemsize, gt_v.dtype.itemsize)
    rows_budget = max(row_mult, (_target_tile_bytes() // bytes_per_row) // row_mult * row_mult)
    t_cap = max(row_mult, (min(block_rows, rows_budget) // row_mult) * row_mult)
    t_rows = n_rows if n_rows <= t_cap else t_cap         # small problems -> single block

    nb = pl.cdiv(n_rows, t_rows)                          # total row-blocks of work
    splits = max(1, min(num_splits, nb))                  # leading parallel axis (v7x 2 TCs)
    steps = pl.cdiv(nb, splits)
    needs_tail = (splits * steps * t_rows) != n_rows
    last_block = nb - 1

    # Padded grid points (s*steps + k >= nb) re-read the last block (clamped index); their
    # contribution is zeroed in-kernel by the logical row-validity mask.
    def in_map(s, k):
        return (jnp.minimum(s * steps + k, last_block), 0)

    kernel = _make_kernel(t_rows, steps, n_rows, coord, needs_tail)

    vmem_bytes = (
        2 * t_rows * lane_width * (pred_v.dtype.itemsize + gt_v.dtype.itemsize)  # pred+gt x2 bufs
        + 2 * t_rows * _LANES * mask_v.dtype.itemsize                            # mask x2 bufs
        + lane_width * _LANES * 4                                                # E scratch
        + (6 << 20))                                                             # headroom
    vmem_limit = int(min(max(vmem_bytes, 32 << 20), 48 << 20))

    loss_part, mask_part = pl.pallas_call(
        kernel,
        out_shape=(jax.ShapeDtypeStruct((splits, _SUBLANES, _LANES), jnp.float32),
                   jax.ShapeDtypeStruct((splits, _SUBLANES, _LANES), jnp.float32)),
        grid_spec=pltpu.PrefetchScalarGridSpec(
            num_scalar_prefetch=0,
            grid=(splits, steps),
            in_specs=[
                pl.BlockSpec((t_rows, lane_width), in_map),
                pl.BlockSpec((t_rows, lane_width), in_map),
                pl.BlockSpec((t_rows, _LANES), in_map),
            ],
            out_specs=[
                pl.BlockSpec((1, _SUBLANES, _LANES), lambda s, k: (s, 0, 0)),
                pl.BlockSpec((1, _SUBLANES, _LANES), lambda s, k: (s, 0, 0)),
            ],
            scratch_shapes=[
                pltpu.VMEM((lane_width, _LANES), jnp.float32),   # coordinate-reduction matrix E
            ],
        ),
        compiler_params=pltpu.CompilerParams(
            dimension_semantics=("parallel", "arbitrary"),
            vmem_limit_bytes=vmem_limit,
        ),
    )(pred_v, gt_v, mask_v)

    # Tiny final combine in the wrapper (splits * 8 * 128 partials per sum).
    loss_sum = jnp.sum(loss_part)
    mask_sum = jnp.sum(mask_part)
    return (loss_sum + jnp.float32(1e-9)) / (mask_sum + jnp.float32(1e-9))


def _ref_loss(p, g, m):
    diff = jnp.sum(jnp.abs(p - g), axis=-1, keepdims=True)
    return (jnp.sum(m * diff) + 1e-9) / (jnp.sum(m) + 1e-9)


if __name__ == "__main__":
    key = jax.random.PRNGKey(0)
    keys = jax.random.split(key, 9)
    C = 3

    # Test 1: module-sized small input -> single-block path (N=512 points, padded to 1024).
    B, H, W = 2, 16, 16
    p1 = jax.random.normal(keys[0], (B, H, W, C), dtype=jnp.float32)
    g1 = jax.random.normal(keys[1], (B, H, W, C), dtype=jnp.float32)
    m1 = (jax.random.uniform(keys[2], (B, H, W, 1)) > 0.5).astype(jnp.float32)
    out1 = jax.block_until_ready(plane_criterion_coordinate(p1, g1, m1))
    ref1 = _ref_loss(p1, g1, m1)
    assert jnp.allclose(out1, ref1, rtol=1e-5, atol=1e-6), (out1, ref1)

    # Test 2: multi-block grid with the 2-way parallel split (2048 points -> 2x1 grid).
    B2, H2, W2 = 2, 32, 32
    p2 = jax.random.normal(keys[3], (B2, H2, W2, C), dtype=jnp.float32)
    g2 = jax.random.normal(keys[4], (B2, H2, W2, C), dtype=jnp.float32)
    m2 = (jax.random.uniform(keys[5], (B2, H2, W2, 1)) > 0.5).astype(jnp.float32)
    out2 = jax.block_until_ready(plane_criterion_coordinate(p2, g2, m2, block_rows=8))
    ref2 = _ref_loss(p2, g2, m2)
    assert jnp.allclose(out2, ref2, rtol=1e-5, atol=1e-6), (out2, ref2)

    # Test 3: non-divisible block count -> exercises the runtime-gated tail-mask path.
    N3 = 3 * 1024
    p3 = jax.random.normal(keys[6], (N3, C), dtype=jnp.float32)
    g3 = jax.random.normal(keys[7], (N3, C), dtype=jnp.float32)
    m3 = (jax.random.uniform(keys[8], (N3, 1)) > 0.5).astype(jnp.float32)
    out3 = jax.block_until_ready(plane_criterion_coordinate(p3, g3, m3, block_rows=16))
    ref3 = _ref_loss(p3, g3, m3)
    assert jnp.allclose(out3, ref3, rtol=1e-5, atol=1e-6), (out3, ref3)

    print("KERNEL_OK")
</pallas_src>

<mosaic_0001>
module attributes {stable_mosaic.version = 11 : i64} {
  func.func @kernel(%arg0: i32, %arg1: i32, %arg2: memref<8x384xf32, #tpu.memory_space<vmem>>, %arg3: memref<8x384xf32, #tpu.memory_space<vmem>>, %arg4: memref<8x128xf32, #tpu.memory_space<vmem>>, %arg5: memref<1x8x128xf32, #tpu.memory_space<vmem>>, %arg6: memref<1x8x128xf32, #tpu.memory_space<vmem>>, %arg7: memref<384x128xf32, #tpu.memory_space<vmem>>) attributes {dimension_semantics = [#tpu.dimension_semantics<parallel>, #tpu.dimension_semantics<arbitrary>], iteration_bounds = array<i64: 1, 1>, scalar_prefetch = 0 : i64, scratch_operands = 1 : i64, tpu.core_type = #tpu.core_type<tc>, window_params = [{transform_indices = @transform_0, window_bounds = array<i64: 8, 384>}, {transform_indices = @transform_1, window_bounds = array<i64: 8, 384>}, {transform_indices = @transform_2, window_bounds = array<i64: 8, 128>}, {transform_indices = @transform_3, window_bounds = array<i64: 1, 8, 128>}, {transform_indices = @transform_4, window_bounds = array<i64: 1, 8, 128>}]} {
    %c0_i32 = arith.constant 0 : i32
    %0 = arith.cmpi eq, %arg1, %c0_i32 : i32
    %1 = arith.extui %0 : i1 to i32
    %c0_i32_0 = arith.constant 0 : i32
    %2 = arith.cmpi ne, %1, %c0_i32_0 : i32
    scf.if %2 {
      %cst_22 = arith.constant 0.000000e+00 : f32
      %27 = vector.broadcast %cst_22 : f32 to vector<1x8x128xf32>
      %c0_23 = arith.constant 0 : index
      %c0_24 = arith.constant 0 : index
      %c0_25 = arith.constant 0 : index
      %28 = vector.load %arg5[%c0_23, %c0_24, %c0_25] : memref<1x8x128xf32, #tpu.memory_space<vmem>>, vector<1x8x128xf32>
      tpu.vector_store %arg5[%c0_23, %c0_24, %c0_25], %27 {strides = array<i32>} : memref<1x8x128xf32, #tpu.memory_space<vmem>>, vector<1x8x128xf32>,
      %cst_26 = arith.constant 0.000000e+00 : f32
      %29 = vector.broadcast %cst_26 : f32 to vector<1x8x128xf32>
      %c0_27 = arith.constant 0 : index
      %c0_28 = arith.constant 0 : index
      %c0_29 = arith.constant 0 : index
      %30 = vector.load %arg6[%c0_27, %c0_28, %c0_29] : memref<1x8x128xf32, #tpu.memory_space<vmem>>, vector<1x8x128xf32>
      tpu.vector_store %arg6[%c0_27, %c0_28, %c0_29], %29 {strides = array<i32>} : memref<1x8x128xf32, #tpu.memory_space<vmem>>, vector<1x8x128xf32>,
      %31 = tpu.iota {dimensions = array<i32: 0>} : vector<384x128xi32>
      %32 = tpu.iota {dimensions = array<i32: 1>} : vector<384x128xi32>
      %c3_i32 = arith.constant 3 : i32
      %33 = vector.broadcast %c3_i32 : i32 to vector<384x128xi32>
      %34 = arith.muli %32, %33 : vector<384x128xi32>
      %35 = arith.cmpi sge, %31, %34 : vector<384x128xi32>
      %c3_i32_30 = arith.constant 3 : i32
      %36 = vector.broadcast %c3_i32_30 : i32 to vector<384x128xi32>
      %37 = arith.addi %34, %36 : vector<384x128xi32>
      %38 = arith.cmpi slt, %31, %37 : vector<384x128xi32>
      %39 = arith.andi %35, %38 : vector<384x128xi1>
      %40 = arith.extui %39 : vector<384x128xi1> to vector<384x128xi32>
      %41 = arith.sitofp %40 : vector<384x128xi32> to vector<384x128xf32>
      %c0_31 = arith.constant 0 : index
      %c0_32 = arith.constant 0 : index
      %42 = vector.load %arg7[%c0_31, %c0_32] : memref<384x128xf32, #tpu.memory_space<vmem>>, vector<384x128xf32>
      tpu.vector_store %arg7[%c0_31, %c0_32], %41 {strides = array<i32>} : memref<384x128xf32, #tpu.memory_space<vmem>>, vector<384x128xf32>,
    } else {
    }
    %c0 = arith.constant 0 : index
    %c0_1 = arith.constant 0 : index
    %3 = vector.load %arg2[%c0, %c0_1] : memref<8x384xf32, #tpu.memory_space<vmem>>, vector<8x384xf32>
    %c0_2 = arith.constant 0 : index
    %c0_3 = arith.constant 0 : index
    %4 = vector.load %arg3[%c0_2, %c0_3] : memref<8x384xf32, #tpu.memory_space<vmem>>, vector<8x384xf32>
    %c0_4 = arith.constant 0 : index
    %c0_5 = arith.constant 0 : index
    %5 = vector.load %arg4[%c0_4, %c0_5] : memref<8x128xf32, #tpu.memory_space<vmem>>, vector<8x128xf32>
    %6 = arith.subf %3, %4 : vector<8x384xf32>
    %7 = math.absf %6 : vector<8x384xf32>
    %c0_6 = arith.constant 0 : index
    %c0_7 = arith.constant 0 : index
    %8 = vector.load %arg7[%c0_6, %c0_7] : memref<384x128xf32, #tpu.memory_space<vmem>>, vector<384x128xf32>
    %cst = arith.constant dense<0.000000e+00> : vector<8x128xf32>
    %9 = tpu.matmul %7, %8, %cst {dimension_numbers = #tpu.dot_dimension_numbers<[1], [0], [0], [1], [0, 0, 1, 1], [], []>} : vector<8x384xf32>, vector<384x128xf32>, vector<8x128xf32> -> vector<8x128xf32>
    %10 = arith.mulf %5, %9 : vector<8x128xf32>
    %c0_8 = arith.constant 0 : index
    %c0_9 = arith.constant 0 : index
    %c0_10 = arith.constant 0 : index
    %11 = vector.load %arg5[%c0_8, %c0_9, %c0_10] : memref<1x8x128xf32, #tpu.memory_space<vmem>>, vector<1x8x128xf32>
    %12 = vector.shape_cast %11 : vector<1x8x128xf32> to vector<8x128xf32>
    %13 = vector.shape_cast %10 : vector<8x128xf32> to vector<1x8x128xf32>
    %cst_11 = arith.constant dense<0.000000e+00> : vector<8x128xf32>
    %14 = vector.multi_reduction <add>, %13, %cst_11 [0] : vector<1x8x128xf32> to vector<8x128xf32>
    %15 = arith.addf %12, %14 : vector<8x128xf32>
    %c0_12 = arith.constant 0 : index
    %c0_13 = arith.constant 0 : index
    %c0_14 = arith.constant 0 : index
    %16 = vector.load %arg5[%c0_12, %c0_13, %c0_14] : memref<1x8x128xf32, #tpu.memory_space<vmem>>, vector<1x8x128xf32>
    %17 = vector.shape_cast %16 : vector<1x8x128xf32> to vector<8x128xf32>
    %18 = vector.shape_cast %15 : vector<8x128xf32> to vector<1x8x128xf32>
    tpu.vector_store %arg5[%c0_12, %c0_13, %c0_14], %18 {strides = array<i32>} : memref<1x8x128xf32, #tpu.memory_space<vmem>>, vector<1x8x128xf32>,
    %c0_15 = arith.constant 0 : index
    %c0_16 = arith.constant 0 : index
    %c0_17 = arith.constant 0 : index
    %19 = vector.load %arg6[%c0_15, %c0_16, %c0_17] : memref<1x8x128xf32, #tpu.memory_space<vmem>>, vector<1x8x128xf32>
    %20 = vector.shape_cast %19 : vector<1x8x128xf32> to vector<8x128xf32>
    %21 = vector.shape_cast %5 : vector<8x128xf32> to vector<1x8x128xf32>
    %cst_18 = arith.constant dense<0.000000e+00> : vector<8x128xf32>
    %22 = vector.multi_reduction <add>, %21, %cst_18 [0] : vector<1x8x128xf32> to vector<8x128xf32>
    %23 = arith.addf %20, %22 : vector<8x128xf32>
    %c0_19 = arith.constant 0 : index
    %c0_20 = arith.constant 0 : index
    %c0_21 = arith.constant 0 : index
    %24 = vector.load %arg6[%c0_19, %c0_20, %c0_21] : memref<1x8x128xf32, #tpu.memory_space<vmem>>, vector<1x8x128xf32>
    %25 = vector.shape_cast %24 : vector<1x8x128xf32> to vector<8x128xf32>
    %26 = vector.shape_cast %23 : vector<8x128xf32> to vector<1x8x128xf32>
    tpu.vector_store %arg6[%c0_19, %c0_20, %c0_21], %26 {strides = array<i32>} : memref<1x8x128xf32, #tpu.memory_space<vmem>>, vector<1x8x128xf32>,
    return
  }
  func.func @transform_0(%arg0: i32, %arg1: i32) -> (i32, i32) {
    %c1_i32 = arith.constant 1 : i32
    %0 = arith.muli %arg0, %c1_i32 : i32
    %1 = arith.addi %0, %arg1 : i32
    %c0_i32 = arith.constant 0 : i32
    %2 = arith.minsi %1, %c0_i32 : i32
    %c0_i32_0 = arith.constant 0 : i32
    %c0_i32_1 = arith.constant 0 : i32
    return %2, %c0_i32_0 : i32, i32
  }
  func.func @transform_1(%arg0: i32, %arg1: i32) -> (i32, i32) {
    %c1_i32 = arith.constant 1 : i32
    %0 = arith.muli %arg0, %c1_i32 : i32
    %1 = arith.addi %0, %arg1 : i32
    %c0_i32 = arith.constant 0 : i32
    %2 = arith.minsi %1, %c0_i32 : i32
    %c0_i32_0 = arith.constant 0 : i32
    %c0_i32_1 = arith.constant 0 : i32
    return %2, %c0_i32_0 : i32, i32
  }
  func.func @transform_2(%arg0: i32, %arg1: i32) -> (i32, i32) {
    %c1_i32 = arith.constant 1 : i32
    %0 = arith.muli %arg0, %c1_i32 : i32
    %1 = arith.addi %0, %arg1 : i32
    %c0_i32 = arith.constant 0 : i32
    %2 = arith.minsi %1, %c0_i32 : i32
    %c0_i32_0 = arith.constant 0 : i32
    %c0_i32_1 = arith.constant 0 : i32
    return %2, %c0_i32_0 : i32, i32
  }
  func.func @transform_3(%arg0: i32, %arg1: i32) -> (i32, i32, i32) {
    %c0_i32 = arith.constant 0 : i32
    %c0_i32_0 = arith.constant 0 : i32
    %c0_i32_1 = arith.constant 0 : i32
    return %arg0, %c0_i32, %c0_i32_0 : i32, i32, i32
  }
  func.func @transform_4(%arg0: i32, %arg1: i32) -> (i32, i32, i32) {
    %c0_i32 = arith.constant 0 : i32
    %c0_i32_0 = arith.constant 0 : i32
    %c0_i32_1 = arith.constant 0 : i32
    return %arg0, %c0_i32, %c0_i32_0 : i32, i32, i32
  }
}

</mosaic_0001>

<bundles_post_ra>
// kernel: plane_criterion_coordinate.1
= control target key start
LH: loop header
LB: loop body
LE: loop exit
PB: predicated region body
PF: predicated region fallthrough
CT: control target
= control target key end

     0   :  { %v109_v0 = vlaneseq  ;;  %v704_v13 = vmov 1.0   ;;  %s1005_s0 = inlined_call_operand.vmem [shape: f32[8,384], index: 0, kind: input, shape index: {}]   ;;  %s1006_s1 = inlined_call_operand.vmem [shape: f32[8,384], index: 1, kind: input, shape index: {}]   ;;  %s1007_s2 = inlined_call_operand.vmem [shape: f32[8,128], index: 2, kind: input, shape index: {}]   ;;  %s1008_s4 = inlined_call_operand.vmem [shape: f32[1,8,128], index: 4, kind: output, shape index: {1}]   ;;  %s1009_s3 = inlined_call_operand.vmem [shape: f32[1,8,128], index: 3, kind: output, shape index: {0}]  }
   0x1   :  { %v452_v48 = vld [vmem:[%s1005_s0 + $0x10] sm:$0xff]  ;;  %v450_v54 = vld [vmem:[%s1005_s0] sm:$0xff]  ;;  %v451_v57 = vld [vmem:[%s1005_s0 + $0x8] sm:$0xff] }
   0x2   :  { %v730_v1 = vshrl.u32 %v109_v0, 7  ;;  %v159_v2 = vand.u32 127, %v109_v0  ;;  %v455_v49 = vld [vmem:[%s1006_s1 + $0x10] sm:$0xff]  ;;  %v453_v55 = vld [vmem:[%s1006_s1] sm:$0xff]  ;;  %v454_v58 = vld [vmem:[%s1006_s1 + $0x8] sm:$0xff] }
   0x3   :  { %v459_v52 = vsub.f32 %v452_v48, %v455_v49  ;;  %v457_v60 = vsub.f32 %v450_v54, %v453_v55  ;;  %v458_v62 = vsub.f32 %v451_v57, %v454_v58 }
   0x4   :  { %v157_v3 = vadd.s32 376, %v730_v1  ;;  %v733_v4 = vmul.u32 3, %v159_v2  ;;  %v156_v5 = vadd.s32 368, %v730_v1  ;;  %v125_v6 = vadd.s32 120, %v730_v1 }
   0x5   :  { %v141_v7 = vadd.s32 248, %v730_v1  ;;  %v155_v9 = vadd.s32 360, %v730_v1  ;;  %v124_v10 = vadd.s32 112, %v730_v1  ;;  %v140_v11 = vadd.s32 240, %v730_v1 }
   0x6   :  { %vm208_vm0 = vcmp.ge.s32.totalorder %v157_v3, %v733_v4  ;;  %v740_v8 = vadd.s32 3, %v733_v4  ;;  %vm207_vm1 = vcmp.ge.s32.totalorder %v156_v5, %v733_v4  ;;  %vm176_vm4 = vcmp.ge.s32.totalorder %v125_v6, %v733_v4 }
   0x7   :  { %vm192_vm7 = vcmp.ge.s32.totalorder %v141_v7, %v733_v4  ;;  %v154_v12 = vadd.s32 352, %v730_v1  ;;  %vm206_vm10 = vcmp.ge.s32.totalorder %v155_v9, %v733_v4  ;;  %v123_v14 = vadd.s32 104, %v730_v1 }
   0x8   :  { %vm257_vm2 = vcmp.lt.s32.totalorder %v157_v3, %v740_v8  ;;  %vm256_vm3 = vcmp.lt.s32.totalorder %v156_v5, %v740_v8  ;;  %vm225_vm5 = vcmp.lt.s32.totalorder %v125_v6, %v740_v8  ;;  %vm241_vm8 = vcmp.lt.s32.totalorder %v141_v7, %v740_v8 }
   0x9   :  { %vm305_vm6 = vmand %vm208_vm0, %vm257_vm2  ;;  %vm255_vm11 = vcmp.lt.s32.totalorder %v155_v9, %v740_v8  ;;  %vm175_vm13 = vcmp.ge.s32.totalorder %v124_v10, %v733_v4  ;;  %vm224_vm14 = vcmp.lt.s32.totalorder %v124_v10, %v740_v8  ;;  %v139_v15 = vadd.s32 232, %v730_v1 }
   0xa   :  { %686 = vmatpush.msk.msra.mxu2 %vm305_vm6, %v704_v13  ;;  %vm304_vm9 = vmand %vm207_vm1, %vm256_vm3  ;;  %vm191_vm0 = vcmp.ge.s32.totalorder %v140_v11, %v733_v4  ;;  %vm240_vm1 = vcmp.lt.s32.totalorder %v140_v11, %v740_v8  ;;  %v153_v16 = vadd.s32 344, %v730_v1  ;;  %vm205_vm3 = vcmp.ge.s32.totalorder %v154_v12, %v733_v4 }
   0xb   :  { %vm273_vm12 = vmand %vm176_vm4, %vm225_vm5  ;;  %vm254_vm4 = vcmp.lt.s32.totalorder %v154_v12, %v740_v8  ;;  %v122_v17 = vadd.s32 96, %v730_v1  ;;  %vm174_vm6 = vcmp.ge.s32.totalorder %v123_v14, %v733_v4  ;;  %v138_v18 = vadd.s32 224, %v730_v1 }
   0xc   :  { %687 = vmatpush.msk.msra.mxu2 %vm304_vm9, %v704_v13  ;;  %654 = vmatpush.msk.msra.mxu0 %vm273_vm12, %v704_v13  ;;  %vm289_vm15 = vmand %vm192_vm7, %vm241_vm8  ;;  %vm223_vm7 = vcmp.lt.s32.totalorder %v123_v14, %v740_v8  ;;  %vm190_vm9 = vcmp.ge.s32.totalorder %v139_v15, %v733_v4  ;;  %v152_v19 = vadd.s32 336, %v730_v1  ;;  %vm204_vm12 = vcmp.ge.s32.totalorder %v153_v16, %v733_v4 }
   0xd   :  { %670 = vmatpush.msk.msra.mxu1 %vm289_vm15, %v704_v13  ;;  %vm303_vm2 = vmand %vm206_vm10, %vm255_vm11  ;;  %vm239_vm10 = vcmp.lt.s32.totalorder %v139_v15, %v740_v8  ;;  %v121_v20 = vadd.s32 88, %v730_v1  ;;  %vm173_vm15 = vcmp.ge.s32.totalorder %v122_v17, %v733_v4  ;;  %v137_v21 = vadd.s32 216, %v730_v1 }
   0xe   :  { %688 = vmatpush.msk.msra.mxu2 %vm303_vm2, %v704_v13  ;;  %vm272_vm5 = vmand %vm175_vm13, %vm224_vm14  ;;  %vm253_vm13 = vcmp.lt.s32.totalorder %v153_v16, %v740_v8  ;;  %vm189_vm2 = vcmp.ge.s32.totalorder %v138_v18, %v733_v4  ;;  %v151_v22 = vadd.s32 328, %v730_v1  ;;  %v120_v23 = vadd.s32 80, %v730_v1 }
   0xf   :  { %655 = vmatpush.msk.msra.mxu0 %vm272_vm5, %v704_v13  ;;  %vm288_vm8 = vmand %vm191_vm0, %vm240_vm1  ;;  %vm222_vm0 = vcmp.lt.s32.totalorder %v122_v17, %v740_v8  ;;  %vm203_vm5 = vcmp.ge.s32.totalorder %v152_v19, %v733_v4  ;;  %v136_v24 = vadd.s32 208, %v730_v1  ;;  %v150_v25 = vadd.s32 320, %v730_v1 }
  0x10   :  { %671 = vmatpush.msk.msra.mxu1 %vm288_vm8, %v704_v13  ;;  %vm302_vm11 = vmand %vm205_vm3, %vm254_vm4  ;;  %vm238_vm3 = vcmp.lt.s32.totalorder %v138_v18, %v740_v8  ;;  %vm172_vm8 = vcmp.ge.s32.totalorder %v121_v20, %v733_v4  ;;  %v119_v26 = vadd.s32 72, %v730_v1  ;;  %v135_v27 = vadd.s32 200, %v730_v1 }
  0x11   :  { %689 = vmatpush.msk.msra.mxu2 %vm302_vm11, %v704_v13  ;;  %vm271_vm14 = vmand %vm174_vm6, %vm223_vm7  ;;  %vm252_vm6 = vcmp.lt.s32.totalorder %v152_v19, %v740_v8  ;;  %vm188_vm11 = vcmp.ge.s32.totalorder %v137_v21, %v733_v4  ;;  %v149_v28 = vadd.s32 312, %v730_v1  ;;  %v118_v29 = vadd.s32 64, %v730_v1 }
  0x12   :  { %656 = vmatpush.msk.msra.mxu0 %vm271_vm14, %v704_v13  ;;  %vm287_vm1 = vmand %vm190_vm9, %vm239_vm10  ;;  %vm221_vm9 = vcmp.lt.s32.totalorder %v121_v20, %v740_v8  ;;  %vm202_vm14 = vcmp.ge.s32.totalorder %v151_v22, %v733_v4  ;;  %v134_v30 = vadd.s32 192, %v730_v1  ;;  %v148_v31 = vadd.s32 304, %v730_v1 }
  0x13   :  { %672 = vmatpush.msk.msra.mxu1 %vm287_vm1, %v704_v13  ;;  %vm301_vm4 = vmand %vm204_vm12, %vm253_vm13  ;;  %vm237_vm12 = vcmp.lt.s32.totalorder %v137_v21, %v740_v8  ;;  %vm171_vm1 = vcmp.ge.s32.totalorder %v120_v23, %v733_v4  ;;  %v117_v32 = vadd.s32 56, %v730_v1  ;;  %v133_v33 = vadd.s32 184, %v730_v1 }
  0x14   :  { %690 = vmatpush.msk.msra.mxu2 %vm301_vm4, %v704_v13  ;;  %vm270_vm7 = vmand %vm173_vm15, %vm222_vm0  ;;  %vm251_vm15 = vcmp.lt.s32.totalorder %v151_v22, %v740_v8  ;;  %vm187_vm4 = vcmp.ge.s32.totalorder %v136_v24, %v733_v4  ;;  %v147_v34 = vadd.s32 296, %v730_v1  ;;  %v116_v35 = vadd.s32 48, %v730_v1 }
  0x15   :  { %657 = vmatpush.msk.msra.mxu0 %vm270_vm7, %v704_v13  ;;  %vm286_vm10 = vmand %vm189_vm2, %vm238_vm3  ;;  %vm220_vm2 = vcmp.lt.s32.totalorder %v120_v23, %v740_v8  ;;  %vm201_vm7 = vcmp.ge.s32.totalorder %v150_v25, %v733_v4  ;;  %v132_v36 = vadd.s32 176, %v730_v1  ;;  %v146_v37 = vadd.s32 288, %v730_v1 }
  0x16   :  { %673 = vmatpush.msk.msra.mxu1 %vm286_vm10, %v704_v13  ;;  %vm300_vm13 = vmand %vm203_vm5, %vm252_vm6  ;;  %vm236_vm5 = vcmp.lt.s32.totalorder %v136_v24, %v740_v8  ;;  %vm170_vm10 = vcmp.ge.s32.totalorder %v119_v26, %v733_v4  ;;  %v115_v38 = vadd.s32 40, %v730_v1  ;;  %v131_v39 = vadd.s32 168, %v730_v1 }
  0x17   :  { %691 = vmatpush.msk.msra.mxu2 %vm300_vm13, %v704_v13  ;;  %vm269_vm0 = vmand %vm172_vm8, %vm221_vm9  ;;  %vm250_vm8 = vcmp.lt.s32.totalorder %v150_v25, %v740_v8  ;;  %vm186_vm13 = vcmp.ge.s32.totalorder %v135_v27, %v733_v4  ;;  %v145_v40 = vadd.s32 280, %v730_v1  ;;  %v114_v41 = vadd.s32 32, %v730_v1 }
  0x18   :  { %658 = vmatpush.msk.msra.mxu0 %vm269_vm0, %v704_v13  ;;  %vm285_vm3 = vmand %vm188_vm11, %vm237_vm12  ;;  %vm219_vm11 = vcmp.lt.s32.totalorder %v119_v26, %v740_v8  ;;  %vm200_vm0 = vcmp.ge.s32.totalorder %v149_v28, %v733_v4  ;;  %v130_v42 = vadd.s32 160, %v730_v1  ;;  %v144_v43 = vadd.s32 272, %v730_v1 }
  0x19   :  { %674 = vmatpush.msk.msra.mxu1 %vm285_vm3, %v704_v13  ;;  %vm299_vm6 = vmand %vm202_vm14, %vm251_vm15  ;;  %vm235_vm14 = vcmp.lt.s32.totalorder %v135_v27, %v740_v8  ;;  %vm169_vm3 = vcmp.ge.s32.totalorder %v118_v29, %v733_v4  ;;  %v113_v44 = vadd.s32 24, %v730_v1  ;;  %v129_v45 = vadd.s32 152, %v730_v1 }
  0x1a   :  { %692 = vmatpush.msk.msra.mxu2 %vm299_vm6, %v704_v13  ;;  %vm268_vm9 = vmand %vm171_vm1, %vm220_vm2  ;;  %vm249_vm1 = vcmp.lt.s32.totalorder %v149_v28, %v740_v8  ;;  %vm185_vm6 = vcmp.ge.s32.totalorder %v134_v30, %v733_v4  ;;  %v143_v46 = vadd.s32 264, %v730_v1  ;;  %v112_v47 = vadd.s32 16, %v730_v1 }
  0x1b   :  { %659 = vmatpush.msk.msra.mxu0 %vm268_vm9, %v704_v13  ;;  %vm284_vm12 = vmand %vm187_vm4, %vm236_vm5  ;;  %vm218_vm4 = vcmp.lt.s32.totalorder %v118_v29, %v740_v8  ;;  %vm199_vm9 = vcmp.ge.s32.totalorder %v148_v31, %v733_v4  ;;  %v128_v50 = vadd.s32 144, %v730_v1  ;;  %v142_v51 = vadd.s32 256, %v730_v1 }
  0x1c   :  { %675 = vmatpush.msk.msra.mxu1 %vm284_vm12, %v704_v13  ;;  %vm298_vm15 = vmand %vm201_vm7, %vm250_vm8  ;;  %vm234_vm7 = vcmp.lt.s32.totalorder %v134_v30, %v740_v8  ;;  %vm168_vm12 = vcmp.ge.s32.totalorder %v117_v32, %v733_v4  ;;  %v111_v53 = vadd.s32 8, %v730_v1  ;;  %v127_v56 = vadd.s32 136, %v730_v1 }
  0x1d   :  { %693 = vmatpush.msk.msra.mxu2 %vm298_vm15, %v704_v13  ;;  %vm267_vm2 = vmand %vm170_vm10, %vm219_vm11  ;;  %vm248_vm10 = vcmp.lt.s32.totalorder %v148_v31, %v740_v8  ;;  %vm184_vm15 = vcmp.ge.s32.totalorder %v133_v33, %v733_v4  ;;  %v126_v59 = vadd.s32 128, %v730_v1  ;;  %v462_v61 = vand.u32 2147483647, %v459_v52 }
  0x1e   :  { %660 = vmatpush.msk.msra.mxu0 %vm267_vm2, %v704_v13  ;;  %vm283_vm5 = vmand %vm186_vm13, %vm235_vm14  ;;  %vm217_vm13 = vcmp.lt.s32.totalorder %v117_v32, %v740_v8  ;;  %vm198_vm2 = vcmp.ge.s32.totalorder %v147_v34, %v733_v4  ;;  %v460_v63 = vand.u32 2147483647, %v457_v60  ;;  %v461_v0 = vand.u32 2147483647, %v458_v62 }
  0x1f   :  { %676 = vmatpush.msk.msra.mxu1 %vm283_vm5, %v704_v13  ;;  %vm297_vm8 = vmand %vm200_vm0, %vm249_vm1  ;;  %vm233_vm0 = vcmp.lt.s32.totalorder %v133_v33, %v740_v8  ;;  %vm167_vm5 = vcmp.ge.s32.totalorder %v116_v35, %v733_v4 }
  0x20   :  { %694 = vmatpush.msk.msra.mxu2 %vm297_vm8, %v704_v13  ;;  %vm266_vm11 = vmand %vm169_vm3, %vm218_vm4  ;;  %vm247_vm3 = vcmp.lt.s32.totalorder %v147_v34, %v740_v8  ;;  %vm183_vm8 = vcmp.ge.s32.totalorder %v132_v36, %v733_v4 }
  0x21   :  { %661 = vmatpush.msk.msra.mxu0 %vm266_vm11, %v704_v13  ;;  %vm282_vm14 = vmand %vm185_vm6, %vm234_vm7  ;;  %vm216_vm6 = vcmp.lt.s32.totalorder %v116_v35, %v740_v8  ;;  %vm197_vm11 = vcmp.ge.s32.totalorder %v146_v37, %v733_v4 }
  0x22   :  { %677 = vmatpush.msk.msra.mxu1 %vm282_vm14, %v704_v13  ;;  %vm296_vm1 = vmand %vm199_vm9, %vm248_vm10  ;;  %vm232_vm9 = vcmp.lt.s32.totalorder %v132_v36, %v740_v8  ;;  %vm166_vm14 = vcmp.ge.s32.totalorder %v115_v38, %v733_v4 }
  0x23   :  { %695 = vmatpush.msk.msra.mxu2 %vm296_vm1, %v704_v13  ;;  %vm265_vm4 = vmand %vm168_vm12, %vm217_vm13  ;;  %vm246_vm12 = vcmp.lt.s32.totalorder %v146_v37, %v740_v8  ;;  %vm182_vm1 = vcmp.ge.s32.totalorder %v131_v39, %v733_v4 }
  0x24   :  { %662 = vmatpush.msk.msra.mxu0 %vm265_vm4, %v704_v13  ;;  %vm281_vm7 = vmand %vm184_vm15, %vm233_vm0  ;;  %vm215_vm15 = vcmp.lt.s32.totalorder %v115_v38, %v740_v8  ;;  %vm196_vm4 = vcmp.ge.s32.totalorder %v145_v40, %v733_v4 }
  0x25   :  { %678 = vmatpush.msk.msra.mxu1 %vm281_vm7, %v704_v13  ;;  %vm295_vm10 = vmand %vm198_vm2, %vm247_vm3  ;;  %vm231_vm2 = vcmp.lt.s32.totalorder %v131_v39, %v740_v8  ;;  %vm165_vm7 = vcmp.ge.s32.totalorder %v114_v41, %v733_v4 }
  0x26   :  { %696 = vmatpush.msk.msra.mxu2 %vm295_vm10, %v704_v13  ;;  %vm264_vm13 = vmand %vm167_vm5, %vm216_vm6  ;;  %vm245_vm5 = vcmp.lt.s32.totalorder %v145_v40, %v740_v8  ;;  %vm181_vm10 = vcmp.ge.s32.totalorder %v130_v42, %v733_v4 }
  0x27   :  { %663 = vmatpush.msk.msra.mxu0 %vm264_vm13, %v704_v13  ;;  %vm280_vm0 = vmand %vm183_vm8, %vm232_vm9  ;;  %vm214_vm8 = vcmp.lt.s32.totalorder %v114_v41, %v740_v8  ;;  %vm195_vm13 = vcmp.ge.s32.totalorder %v144_v43, %v733_v4 }
  0x28   :  { %679 = vmatpush.msk.msra.mxu1 %vm280_vm0, %v704_v13  ;;  %vm294_vm3 = vmand %vm197_vm11, %vm246_vm12  ;;  %vm230_vm11 = vcmp.lt.s32.totalorder %v130_v42, %v740_v8  ;;  %vm164_vm0 = vcmp.ge.s32.totalorder %v113_v44, %v733_v4 }
  0x29   :  { %697 = vmatpush.msk.msra.mxu2 %vm294_vm3, %v704_v13  ;;  %vm263_vm6 = vmand %vm166_vm14, %vm215_vm15  ;;  %vm244_vm14 = vcmp.lt.s32.totalorder %v144_v43, %v740_v8  ;;  %vm180_vm3 = vcmp.ge.s32.totalorder %v129_v45, %v733_v4 }
  0x2a   :  { %664 = vmatpush.msk.msra.mxu0 %vm263_vm6, %v704_v13  ;;  %vm279_vm9 = vmand %vm182_vm1, %vm231_vm2  ;;  %vm213_vm1 = vcmp.lt.s32.totalorder %v113_v44, %v740_v8  ;;  %vm194_vm6 = vcmp.ge.s32.totalorder %v143_v46, %v733_v4 }
  0x2b   :  { %680 = vmatpush.msk.msra.mxu1 %vm279_vm9, %v704_v13  ;;  %vm293_vm12 = vmand %vm196_vm4, %vm245_vm5  ;;  %vm229_vm4 = vcmp.lt.s32.totalorder %v129_v45, %v740_v8  ;;  %vm163_vm9 = vcmp.ge.s32.totalorder %v112_v47, %v733_v4 }
  0x2c   :  { %698 = vmatpush.msk.msra.mxu2 %vm293_vm12, %v704_v13  ;;  %vm262_vm15 = vmand %vm165_vm7, %vm214_vm8  ;;  %vm243_vm7 = vcmp.lt.s32.totalorder %v143_v46, %v740_v8  ;;  %vm179_vm12 = vcmp.ge.s32.totalorder %v128_v50, %v733_v4 }
  0x2d   :  { %665 = vmatpush.msk.msra.mxu0 %vm262_vm15, %v704_v13  ;;  %vm278_vm2 = vmand %vm181_vm10, %vm230_vm11  ;;  %vm212_vm10 = vcmp.lt.s32.totalorder %v112_v47, %v740_v8  ;;  %vm193_vm15 = vcmp.ge.s32.totalorder %v142_v51, %v733_v4 }
  0x2e   :  { %681 = vmatpush.msk.msra.mxu1 %vm278_vm2, %v704_v13  ;;  %vm292_vm5 = vmand %vm195_vm13, %vm244_vm14  ;;  %vm228_vm13 = vcmp.lt.s32.totalorder %v128_v50, %v740_v8  ;;  %vm162_vm2 = vcmp.ge.s32.totalorder %v111_v53, %v733_v4 }
  0x2f   :  { %699 = vmatpush.msk.msra.mxu2 %vm292_vm5, %v704_v13  ;;  %vm261_vm8 = vmand %vm164_vm0, %vm213_vm1  ;;  %vm242_vm0 = vcmp.lt.s32.totalorder %v142_v51, %v740_v8  ;;  %vm178_vm5 = vcmp.ge.s32.totalorder %v127_v56, %v733_v4 }
  0x30   :  { %666 = vmatpush.msk.msra.mxu0 %vm261_vm8, %v704_v13  ;;  %vm277_vm11 = vmand %vm180_vm3, %vm229_vm4  ;;  %vm211_vm3 = vcmp.lt.s32.totalorder %v111_v53, %v740_v8  ;;  %vm161_vm8 = vcmp.ge.s32.totalorder %v730_v1, %v733_v4 }
  0x31   :  { %682 = vmatpush.msk.msra.mxu1 %vm277_vm11, %v704_v13  ;;  %vm291_vm14 = vmand %vm194_vm6, %vm243_vm7  ;;  %vm227_vm6 = vcmp.lt.s32.totalorder %v127_v56, %v740_v8  ;;  %vm177_vm11 = vcmp.ge.s32.totalorder %v126_v59, %v733_v4 }
  0x32   :  { %700 = vmatpush.msk.msra.mxu2 %vm291_vm14, %v704_v13  ;;  %vm260_vm1 = vmand %vm163_vm9, %vm212_vm10  ;;  %vm210_vm9 = vcmp.lt.s32.totalorder %v730_v1, %v740_v8  ;;  %v456_v1 = vld [vmem:[%s1007_s2] sm:$0xff] }
  0x33   :  { %667 = vmatpush.msk.msra.mxu0 %vm260_vm1, %v704_v13  ;;  %vm276_vm4 = vmand %vm179_vm12, %vm228_vm13  ;;  %vm226_vm12 = vcmp.lt.s32.totalorder %v126_v59, %v740_v8  ;;  %579 = vst [vmem:[%s1008_s4] sm:$0xff] %v456_v1 }
  0x34   :  { %683 = vmatpush.msk.msra.mxu1 %vm276_vm4, %v704_v13  ;;  %vm290_vm7 = vmand %vm193_vm15, %vm242_vm0 }
  0x35   :  { %701 = vmatpush.msk.msra.mxu2 %vm290_vm7, %v704_v13  ;;  %vm259_vm10 = vmand %vm162_vm2, %vm211_vm3 }
  0x36   :  { %567 = vmatmul.f32.vlgmr.msra.gmra.mxu2 %v462_v61  ;;  %668 = vmatpush.msk.msra.mxu0 %vm259_vm10, %v704_v13  ;;  %vm275_vm13 = vmand %vm178_vm5, %vm227_vm6 }
  0x37   :  { %684 = vmatpush.msk.msra.mxu1 %vm275_vm13, %v704_v13  ;;  %vm258_vm14 = vmand %vm161_vm8, %vm210_vm9 }
  0x38   :  { %669 = vmatpush.msk.msra.mxu0 %vm258_vm14, %v704_v13  ;;  %vm274_vm15 = vmand %vm177_vm11, %vm226_vm12 }
  0x39   :  { %685 = vmatpush.msk.msra.mxu1 %vm274_vm15, %v704_v13  ;;  %527 = vmatmul.f32.vlgmr.msra.gmra.mxu0 %v460_v63 }
  0x3a   :  { %547 = vmatmul.f32.vlgmr.msra.gmra.mxu1 %v461_v0 }
  0xb6   :  { %v528_v2 = vpop.f32.mrf.mxu0 }
  0xb7   :  { %v548_v3 = vpop.f32.mrf.mxu1 }
  0xb8   :  { %v549_v4 = vadd.f32 %v548_v3, %v528_v2 }
  0xb9   :  { %v568_v5 = vpop.f32.mrf.mxu2 }
  0xba   :  { %v569_v6 = vadd.f32 %v568_v5, %v549_v4 }
  0xbc   :  { %v571_v7 = vmul.f32 %v569_v6, %v456_v1 }
  0xbe   :  { %575 = vst [vmem:[%s1009_s3] sm:$0xff] %v571_v7 }

</bundles_post_ra>
